<compile_context>
chip_gen: v7x
topology: tpu7x:2x2x1
jax: 0.10.0
libtpu: 0.0.40
codegen_flags: <defaults>
</compile_context>

<pallas_src>
import math

import jax
import jax.numpy as jnp
import numpy as np
from jax.experimental import pallas as pl
from jax.experimental.pallas import tpu as pltpu

# Keep a whole weight tensor resident in VMEM if it is smaller than this.
_RESIDENT_WEIGHT_BYTES = 8 * 1024 * 1024


def _qkv_proj_kernel(x_ref, w_ref, o_ref):
    """One (batch, query-tile, qkv-head-group) step of the fused QKV projection.

    x_ref : (1, tq, d_in)            VMEM (resident across the inner g loop)
    w_ref : (3H, d_in, hd) resident  OR (1, d_in, hd) streamed per group
    o_ref : (1, 1, tq, hd)           VMEM (lane-dense: last dim == head_dim)
    """
    if w_ref.shape[0] == 1:                  # streamed per-group weight slab
        w = w_ref[0]
    else:                                    # all 3H slabs resident; dynamic slice
        w = w_ref[pl.program_id(2)]
    o_ref[0, 0] = jnp.dot(x_ref[0], w,
                          preferred_element_type=jnp.float32).astype(o_ref.dtype)


def _flash_attn_kernel(q_ref, k_ref, v_ref, wproj_ref, bproj_ref, o_ref,
                       m_scr, l_scr, acc_scr, out_scr):
    """Flash attention (online softmax) with the output projection fused in.

    q_ref     : (1, 1, tq, hd)   k_ref / v_ref : (1, 1, tkv, hd)
    wproj_ref : (H, hd, d_out) resident  OR (1, hd, d_out) streamed per head
    bproj_ref : (1, d_out) f32
    o_ref     : (1, tq, d_out)   (lane-dense, written once per (b, qi))
    scratch   : m (tq,1), l (tq,1), acc (tq,hd), out (tq,d_out) — f32, persistent
                across the 'arbitrary' (head, kv) grid axes.
    """
    qi, h, kv = pl.program_id(1), pl.program_id(2), pl.program_id(3)
    num_heads = pl.num_programs(2)
    num_kv = pl.num_programs(3)
    tq = q_ref.shape[2]
    tkv = k_ref.shape[2]
    q_start = qi * tq
    kv_start = kv * tkv

    @pl.when(jnp.logical_and(h == 0, kv == 0))
    def _():
        out_scr[...] = jnp.zeros_like(out_scr)

    @pl.when(kv == 0)
    def _():
        m_scr[...] = jnp.full_like(m_scr, -jnp.inf)
        l_scr[...] = jnp.zeros_like(l_scr)
        acc_scr[...] = jnp.zeros_like(acc_scr)

    def scores():
        # (tq, hd) x (tkv, hd) contracted on hd -> (tq, tkv), f32 accumulate on MXU.
        # 1/sqrt(head_dim) is folded into W_q, so no score scaling here.
        return jax.lax.dot_general(q_ref[0, 0], k_ref[0, 0],
                                   (((1,), (1,)), ((), ())),
                                   preferred_element_type=jnp.float32)

    def online_update(s):
        v = v_ref[0, 0]
        m_prev = m_scr[...]
        m_new = jnp.maximum(m_prev, jnp.max(s, axis=-1, keepdims=True))
        alpha = jnp.exp(m_prev - m_new)
        p = jnp.exp(s - m_new)
        l_scr[...] = alpha * l_scr[...] + jnp.sum(p, axis=-1, keepdims=True)
        acc_scr[...] = alpha * acc_scr[...] + jnp.dot(
            p.astype(v.dtype), v, preferred_element_type=jnp.float32)
        m_scr[...] = m_new

    # Block classification for the causal mask:
    #   needed   : some column of this kv block is visible to some query row.
    #   unmasked : every (row, col) pair satisfies col <= row  ->  skip the mask math.
    block_needed = kv_start <= q_start + tq - 1
    block_unmasked = kv_start + tkv - 1 <= q_start

    @pl.when(jnp.logical_and(block_needed, block_unmasked))
    def _():
        online_update(scores())

    @pl.when(jnp.logical_and(block_needed, jnp.logical_not(block_unmasked)))
    def _():
        s = scores()
        row = q_start + jax.lax.broadcasted_iota(jnp.int32, s.shape, 0)
        col = kv_start + jax.lax.broadcasted_iota(jnp.int32, s.shape, 1)
        online_update(jnp.where(col <= row, s, -jnp.inf))

    @pl.when(kv == num_kv - 1)
    def _():
        # Finalize this head and fold it straight into the output projection:
        #   out += (softmax @ V)_h @ Wproj[h*hd:(h+1)*hd, :]  (== concat-heads @ Wproj)
        # Exact divide here (once per (b, qi, h)); the approx EUP reciprocal was the
        # source of the previous f32 parity failure.
        ctx = acc_scr[...] / l_scr[...]
        if wproj_ref.shape[0] == 1:
            w_h = wproj_ref[0]
        else:
            w_h = wproj_ref[h]
        out_scr[...] += jnp.dot(ctx.astype(w_h.dtype), w_h,
                                preferred_element_type=jnp.float32)

    @pl.when(jnp.logical_and(h == num_heads - 1, kv == num_kv - 1))
    def _():
        o_ref[0] = (out_scr[...] + bproj_ref[...]).astype(o_ref.dtype)


def mha_forward(x, w_query, w_key, w_value, w_proj, b_proj, *,
                num_heads, context_length, block_q=256, block_kv=256,
                compute_dtype=None):
    """Pallas forward of MultiHeadAttentionEinsum (eval mode, qkv_bias=False).

    x        : (B, S, d_in)
    w_query / w_key / w_value : (d_in, d_out)   (module einsum layout: Q = x @ W)
    w_proj   : (d_out, d_out)                   (out = ctx @ w_proj + b_proj)
    b_proj   : (d_out,)
    compute_dtype: e.g. jnp.bfloat16 for the MXU fast path (recommended on
                   v5e/v6e/v7x); softmax and all accumulation stay in f32.
    """
    batch, seq_len, d_in = x.shape
    d_out = w_query.shape[1]
    assert d_out % num_heads == 0, "d_out must be divisible by num_heads"
    head_dim = d_out // num_heads
    assert seq_len <= context_length, "seq_len must be <= context_length"

    tq = min(block_q, seq_len)
    tkv = min(block_kv, seq_len)
    assert seq_len % tq == 0 and seq_len % tkv == 0, "seq_len must tile evenly"
    num_q = seq_len // tq
    num_kv = seq_len // tkv

    cdt = jnp.dtype(compute_dtype) if compute_dtype is not None else jnp.dtype(x.dtype)
    csize = cdt.itemsize
    osize = jnp.dtype(x.dtype).itemsize
    scale = 1.0 / math.sqrt(head_dim)

    H = num_heads
    G = 3 * num_heads

    # Per-head projection slabs, lane-dense in head_dim; softmax scale folded into W_q.
    # TODO(synk): for head_dim < 128, pack two heads per slab to keep lane width >= 128.
    def to_heads(w):
        return w.reshape(d_in, num_heads, head_dim).transpose(1, 0, 2)  # (H, d_in, hd)

    w_heads = jnp.concatenate(
        [to_heads(w_query * scale), to_heads(w_key), to_heads(w_value)],
        axis=0).astype(cdt)                                             # (3H, d_in, hd)
    x_c = x.astype(cdt)

    # ---- Kernel 1: fused QKV projection -> (B, 3H, S, hd) ----
    w_bytes = G * d_in * head_dim * csize
    if w_bytes <= _RESIDENT_WEIGHT_BYTES:
        # Whole QKV weight stays in VMEM for the entire kernel (constant block index);
        # weight HBM traffic drops from B*(S/tq)*3*d_in*d_out to 3*d_in*d_out bytes.
        w_spec = pl.BlockSpec((G, d_in, head_dim), lambda b, qi, g: (0, 0, 0))
    else:
        w_spec = pl.BlockSpec((1, d_in, head_dim), lambda b, qi, g: (g, 0, 0))

    vmem1 = int(1.5 * (2 * tq * d_in * csize                # x (double-buffered)
                       + 2 * min(w_bytes, _RESIDENT_WEIGHT_BYTES)
                       + 2 * tq * head_dim * csize))        # output block
    vmem1 = min(64 * 1024 * 1024, max(32 * 1024 * 1024, vmem1))

    qkvh = pl.pallas_call(
        _qkv_proj_kernel,
        out_shape=jax.ShapeDtypeStruct((batch, G, seq_len, head_dim), cdt),
        grid=(batch, num_q, G),
        in_specs=[
            pl.BlockSpec((1, tq, d_in), lambda b, qi, g: (b, qi, 0)),
            w_spec,
        ],
        out_specs=pl.BlockSpec((1, 1, tq, head_dim), lambda b, qi, g: (b, g, qi, 0)),
        compiler_params=pltpu.CompilerParams(
            dimension_semantics=("parallel", "parallel", "parallel"),
            vmem_limit_bytes=vmem1),
    )(x_c, w_heads)

    # ---- Kernel 2: flash attention + fused output projection ----
    w_proj_heads = w_proj.reshape(num_heads, head_dim, d_out).astype(cdt)
    b_proj_row = b_proj.reshape(1, d_out).astype(jnp.float32)

    wp_bytes = num_heads * head_dim * d_out * csize
    if wp_bytes <= _RESIDENT_WEIGHT_BYTES:
        # out_proj weight resident once for the whole kernel; sliced per head inside.
        wp_spec = pl.BlockSpec((H, head_dim, d_out), lambda b, qi, h, kv: (0, 0, 0))
    else:
        wp_spec = pl.BlockSpec((1, head_dim, d_out), lambda b, qi, h, kv: (h, 0, 0))

    def last_kv(qi):
        # Last kv block a causal query tile starting at qi*tq ever needs.
        return (qi * tq + tq - 1) // tkv

    # Clamp kv block index for K/V so causally-skipped steps repeat the previous
    # block index and the pipeline elides the redundant HBM->VMEM DMA.
    def k_map(b, qi, h, kv):
        return (b, H + h, jnp.minimum(kv, last_kv(qi)), 0)

    def v_map(b, qi, h, kv):
        return (b, 2 * H + h, jnp.minimum(kv, last_kv(qi)), 0)

    vmem2 = int(1.5 * (2 * tq * head_dim * csize            # Q (double-buffered)
                       + 2 * 2 * tkv * head_dim * csize     # K, V
                       + 2 * min(wp_bytes, _RESIDENT_WEIGHT_BYTES)
                       + 2 * d_out * 4                      # bias
                       + 2 * tq * d_out * osize             # output block
                       + tq * (2 + head_dim + d_out) * 4))  # f32 scratch
    vmem2 = min(64 * 1024 * 1024, max(32 * 1024 * 1024, vmem2))

    out = pl.pallas_call(
        _flash_attn_kernel,
        out_shape=jax.ShapeDtypeStruct((batch, seq_len, d_out), x.dtype),
        grid=(batch, num_q, num_heads, num_kv),
        in_specs=[
            pl.BlockSpec((1, 1, tq, head_dim),
                         lambda b, qi, h, kv: (b, h, qi, 0)),     # Q head h
            pl.BlockSpec((1, 1, tkv, head_dim), k_map),           # K head h (clamped)
            pl.BlockSpec((1, 1, tkv, head_dim), v_map),           # V head h (clamped)
            wp_spec,
            pl.BlockSpec((1, d_out), lambda b, qi, h, kv: (0, 0)),
        ],
        out_specs=pl.BlockSpec((1, tq, d_out), lambda b, qi, h, kv: (b, qi, 0)),
        scratch_shapes=[
            pltpu.VMEM((tq, 1), jnp.float32),         # m (running max)
            pltpu.VMEM((tq, 1), jnp.float32),         # l (running denom)
            pltpu.VMEM((tq, head_dim), jnp.float32),  # per-head context accumulator
            pltpu.VMEM((tq, d_out), jnp.float32),     # fused output-proj accumulator
        ],
        compiler_params=pltpu.CompilerParams(
            dimension_semantics=("parallel", "parallel", "arbitrary", "arbitrary"),
            vmem_limit_bytes=vmem2),
    )(qkvh, qkvh, qkvh, w_proj_heads, b_proj_row)
    return out


def mha_reference(x, w_query, w_key, w_value, w_proj, b_proj, *, num_heads):
    """Pure-JAX reference mirroring the PyTorch forward (eval mode)."""
    batch, seq_len, _ = x.shape
    d_out = w_query.shape[1]
    head_dim = d_out // num_heads
    hp = jax.lax.Precision.HIGHEST

    q = jnp.einsum('bnd,di->bni', x, w_query, precision=hp)
    k = jnp.einsum('bnd,di->bni', x, w_key, precision=hp)
    v = jnp.einsum('bnd,di->bni', x, w_value, precision=hp)

    def heads(t):
        return t.reshape(batch, seq_len, num_heads, head_dim).transpose(0, 2, 1, 3)

    q, k, v = heads(q), heads(k), heads(v)
    s = jnp.einsum('bhqd,bhkd->bhqk', q, k, precision=hp) / math.sqrt(head_dim)
    row = jax.lax.broadcasted_iota(jnp.int32, (seq_len, seq_len), 0)
    col = jax.lax.broadcasted_iota(jnp.int32, (seq_len, seq_len), 1)
    s = jnp.where(col > row, -jnp.inf, s)            # masked_fill(triu(diag=1), -inf)
    p = jax.nn.softmax(s, axis=-1)
    ctx = jnp.einsum('bhqk,bhkd->bhqd', p, v, precision=hp)
    ctx = ctx.transpose(0, 2, 1, 3).reshape(batch, seq_len, d_out)
    return jnp.einsum('bnd,do->bno', ctx, w_proj, precision=hp) + b_proj


if __name__ == "__main__":
    # Module-consistent shapes (the module's einsum requires d_in == d_out).
    # S = 512 with the default 256-wide tiles exercises multi-block online softmax,
    # the causal DMA clamp and the diagonal-only mask path.
    B, S, D_IN, D_OUT, NUM_HEADS, CTX_LEN = 2, 512, 256, 256, 2, 512

    key = jax.random.PRNGKey(0)
    k_x, k_q, k_k, k_v, k_pw, k_pb = jax.random.split(key, 6)

    x = jax.random.normal(k_x, (B, S, D_IN), dtype=jnp.float32)
    w_query = jax.random.normal(k_q, (D_IN, D_OUT), dtype=jnp.float32) / math.sqrt(D_IN)
    w_key = jax.random.normal(k_k, (D_IN, D_OUT), dtype=jnp.float32) / math.sqrt(D_IN)
    w_value = jax.random.normal(k_v, (D_IN, D_OUT), dtype=jnp.float32) / math.sqrt(D_IN)
    w_proj = jax.random.normal(k_pw, (D_OUT, D_OUT), dtype=jnp.float32) / math.sqrt(D_OUT)
    b_proj = jax.random.normal(k_pb, (D_OUT,), dtype=jnp.float32) * 0.02

    ref = mha_reference(x, w_query, w_key, w_value, w_proj, b_proj, num_heads=NUM_HEADS)

    # f32 path: exact softmax normalization -> tight parity with the reference.
    out = mha_forward(x, w_query, w_key, w_value, w_proj, b_proj,
                      num_heads=NUM_HEADS, context_length=CTX_LEN)
    out = jax.block_until_ready(out)
    np.testing.assert_allclose(np.asarray(out), np.asarray(ref), rtol=2e-3, atol=2e-3)

    # bf16 MXU fast path (recommended on v5e/v6e/v7x): matmul inputs in bf16,
    # softmax / accumulation in f32.
    out_bf16 = mha_forward(x, w_query, w_key, w_value, w_proj, b_proj,
                           num_heads=NUM_HEADS, context_length=CTX_LEN,
                           compute_dtype=jnp.bfloat16)
    out_bf16 = jax.block_until_ready(out_bf16)
    np.testing.assert_allclose(np.asarray(out_bf16), np.asarray(ref),
                               rtol=1.5e-1, atol=1.5e-1)

    print("KERNEL_OK")
</pallas_src>

<mosaic_0001>
module attributes {stable_mosaic.version = 11 : i64} {
  func.func @_qkv_proj_kernel(%arg0: i32, %arg1: i32, %arg2: i32, %arg3: memref<1x256x256xf32, #tpu.memory_space<vmem>>, %arg4: memref<6x256x128xf32, #tpu.memory_space<vmem>>, %arg5: memref<1x1x256x128xf32, #tpu.memory_space<vmem>>) attributes {dimension_semantics = [#tpu.dimension_semantics<parallel>, #tpu.dimension_semantics<parallel>, #tpu.dimension_semantics<parallel>], iteration_bounds = array<i64: 2, 2, 6>, scalar_prefetch = 0 : i64, scratch_operands = 0 : i64, tpu.core_type = #tpu.core_type<tc>, window_params = [{transform_indices = @transform_0, window_bounds = array<i64: 1, 256, 256>}, {pipeline_mode = #tpu.pipeline_mode<synchronous>, transform_indices = @transform_1, window_bounds = array<i64: 6, 256, 128>}, {transform_indices = @transform_2, window_bounds = array<i64: 1, 1, 256, 128>}]} {
    %0 = arith.index_cast %arg2 : i32 to index
    %c0 = arith.constant 0 : index
    %c0_0 = arith.constant 0 : index
    %1 = vector.load %arg4[%0, %c0, %c0_0] : memref<6x256x128xf32, #tpu.memory_space<vmem>>, vector<1x256x128xf32>
    %2 = vector.shape_cast %1 : vector<1x256x128xf32> to vector<256x128xf32>
    %c0_1 = arith.constant 0 : index
    %c0_2 = arith.constant 0 : index
    %c0_3 = arith.constant 0 : index
    %3 = vector.load %arg3[%c0_1, %c0_2, %c0_3] : memref<1x256x256xf32, #tpu.memory_space<vmem>>, vector<1x256x256xf32>
    %4 = vector.shape_cast %3 : vector<1x256x256xf32> to vector<256x256xf32>
    %cst = arith.constant dense<0.000000e+00> : vector<256x128xf32>
    %5 = tpu.matmul %4, %2, %cst {dimension_numbers = #tpu.dot_dimension_numbers<[1], [0], [0], [1], [0, 0, 1, 1], [], []>} : vector<256x256xf32>, vector<256x128xf32>, vector<256x128xf32> -> vector<256x128xf32>
    %c0_4 = arith.constant 0 : index
    %c0_5 = arith.constant 0 : index
    %c0_6 = arith.constant 0 : index
    %c0_7 = arith.constant 0 : index
    %6 = vector.load %arg5[%c0_4, %c0_5, %c0_6, %c0_7] : memref<1x1x256x128xf32, #tpu.memory_space<vmem>>, vector<1x1x256x128xf32>
    %7 = vector.shape_cast %6 : vector<1x1x256x128xf32> to vector<256x128xf32>
    %8 = vector.shape_cast %5 : vector<256x128xf32> to vector<1x1x256x128xf32>
    tpu.vector_store %arg5[%c0_4, %c0_5, %c0_6, %c0_7], %8 {strides = array<i32>} : memref<1x1x256x128xf32, #tpu.memory_space<vmem>>, vector<1x1x256x128xf32>,
    return
  }
  func.func @transform_0(%arg0: i32, %arg1: i32, %arg2: i32) -> (i32, i32, i32) {
    %c0_i32 = arith.constant 0 : i32
    %c0_i32_0 = arith.constant 0 : i32
    return %arg0, %arg1, %c0_i32 : i32, i32, i32
  }
  func.func @transform_1(%arg0: i32, %arg1: i32, %arg2: i32) -> (i32, i32, i32) {
    %c0_i32 = arith.constant 0 : i32
    %c0_i32_0 = arith.constant 0 : i32
    %c0_i32_1 = arith.constant 0 : i32
    %c0_i32_2 = arith.constant 0 : i32
    return %c0_i32, %c0_i32_0, %c0_i32_1 : i32, i32, i32
  }
  func.func @transform_2(%arg0: i32, %arg1: i32, %arg2: i32) -> (i32, i32, i32, i32) {
    %c0_i32 = arith.constant 0 : i32
    %c0_i32_0 = arith.constant 0 : i32
    return %arg0, %arg2, %arg1, %c0_i32 : i32, i32, i32, i32
  }
}

</mosaic_0001>

<bundles_post_ra>
// kernel: tpu_custom_call.1
= control target key start
LH: loop header
LB: loop body
LE: loop exit
PB: predicated region body
PF: predicated region fallthrough
CT: control target
= control target key end

     0   :  { %s1622_s0 = inlined_call_operand.hbm [shape: f32[2,512,256], index: 0, kind: input, shape index: {}]   ;;  %s1623_s1 = inlined_call_operand.hbm [shape: f32[6,256,128], index: 1, kind: input, shape index: {}]   ;;  %s1624_s2 = inlined_call_operand.hbm [shape: f32[2,6,512,128], index: 2, kind: output, shape index: {}]  }
   0x1   :  { %1641 = sst [smem:[#allocation21_spill]] %s1623_s1 }
   0x2   :  { %1642 = sst [smem:[#allocation22_spill]] %s1624_s2 }
   0x3   :  { %7 = vsyncpa [#allocation3], 0 }
   0x4   :  { %9 = vsyncpa [#allocation3 + $0x1], 0 }
   0x5   :  { %10 = vsyncpa [#allocation6], 0 }
   0x6   :  { %11 = vsyncpa [#allocation4], 0 }
   0x7   :  { %13 = vsyncpa [#allocation4 + $0x1], 0  ;;  %s1156_s9 = smov 0   ;;  %s1158_s10 = smov 0  }
   0x8   :  { %s1160_s11 = smov 0   ;;  %s1162_s12 = smov 0  }
   0x9   :  { %s1164_s13 = smov 0   ;;  %s1166_s14 = smov 0  }
   0xa   :  { %s1168_s15 = smov 0   ;;  %s1170_s16 = smov 0  }
   0xb   :  { %s1172_s17 = smov 0   ;;  %s1174_s18 = smov 0  }
   0xc   :  { %s1176_s19 = smov 0   ;;  %s1178_s20 = smov 0  }
   0xd   :  { %s1180_s21 = smov 0  }
   0xe LB: > { %1643 = sst [smem:[#allocation11_spill]] %s1081_s9  ;;  %s690_s22 = sadd.s32 4294967295, %s1129_s21   ;;  %s1129_s21 = sphi %s1180_s21, %s19_s21   ;;  %s1125_s20 = sphi %s1178_s20, %s1687_s20   ;;  %s1121_s19 = sphi %s1176_s19, %s1680_s19   ;;  %s1117_s18 = sphi %s1174_s18, %s1679_s18   ;;  %s1113_s17 = sphi %s1172_s17, %s1686_s17   ;;  %s1109_s16 = sphi %s1170_s16, %s1678_s16   ;;  %s1105_s15 = sphi %s1168_s15, %s1677_s15   ;;  %s1101_s14 = sphi %s1166_s14, %s1685_s14   ;;  %s1097_s13 = sphi %s1164_s13, %s1684_s13   ;;  %s1093_s12 = sphi %s1162_s12, %s1683_s12   ;;  %s1089_s11 = sphi %s1160_s11, %s1682_s11   ;;  %s1085_s10 = sphi %s1158_s10, %s1681_s10   ;;  %s1081_s9 = sphi %s1156_s9, %s1676_s9  }
   0xf   : > { %1644 = sst [smem:[#allocation12_spill]] %s1085_s10  ;;  %s691_s23 = sadd.s32 4294967294, %s1129_s21  }
  0x10   : > { %1645 = sst [smem:[#allocation13_spill]] %s1109_s16  ;;  %p60_p0 = scmp.ne.s32.totalorder %s1097_s13, %s1093_s12 }
  0x11   : > { %1646 = sst [smem:[#allocation14_spill]] %s1113_s17  ;;  %p1222_p1 = scmp.eq.s32.totalorder %s690_s22, 0 }
  0x12   : > { %1647 = sst [smem:[#allocation15_spill]] %s1117_s18  ;;  %p108_p2 = scmp.ne.s32.totalorder %s1089_s11, %s1085_s10 }
  0x13   : > { %1648 = sst [smem:[#allocation16_spill]] %s1121_s19  ;;  %p1231_p3 = por %p1222_p1, %p60_p0 }
  0x14   : > { %s1649_s24 = scalar_select %p1222_p1, 1, 0 }
  0x15   : > { %s1650_s26 = scalar_select %p1231_p3, 1, 0 }
  0x16   : > { %p109_p4 = scmp.eq.s32.totalorder %s690_s22, 23  ;;  %p114_p5 = scmp.ne.s32.totalorder %s1085_s10, %s1081_s9 }
  0x17   : > { %p115_p6 = scmp.eq.s32.totalorder %s691_s23, 23  ;;  %p692_p8 = scmp.ge.s32.totalorder %s1129_s21, 1 }
  0x18   : > { %p1237_p7 = por %p109_p4, %p108_p2  ;;  %p122_p10 = scmp.lt.s32.totalorder %s1129_s21, 25 }
  0x19   : > { %p1242_p9 = por %p115_p6, %p114_p5  ;;  %s1131_s30 = smov [#allocation5]  }
  0x1a   : > { %s1651_s27 = scalar_select %p1237_p7, 1, 0 }
  0x1b   : > { %s1653_s28 = scalar_select %p1242_p9, 1, 0 }
  0x1c   : > { %1652 = sst [smem:[#allocation17_spill]] %s1651_s27  ;;  %p1247_p11 = pnand %p692_p8, %p122_p10 }
  0x1d   : > { %1654 = sst [smem:[#allocation18_spill]] %s1653_s28  ;;  %s134_s3 = sshll.u32 %s1131_s30, 4  ;;  %s135_s3 = int_to_ptr.vmem [resolvable:$true] %s134_s3 }
  0x1e   : > { %s1655_s29 = scalar_select %p1247_p11, 1, 0 }
  0x1f   : > { %p801_p12 = pneg %p1247_p11  ;;  %s1657_s1 = sld [smem:[#allocation21_spill]] }
  0x21   : > { %p1255_p13 = pnand %p801_p12, %p1222_p1 }
  0x23   : > { %p931_p2 = pneg %p1255_p13 }
  0x25   : > { %s929_s7 = scalar_lea.hbm %s1657_s1, 24576 }
  0x26   : > { %p930_p0 = scmp.ne.s32.totalorder %s1657_s1, %s929_s7  ;;  %p936_p6 = scmp.lt.u32.totalorder %s929_s7, %s1657_s1 }
  0x28   : > { %p932_p4 = pnand %p931_p2, %p930_p0 }
  0x2a   : > { %p933_p5 = pneg %p932_p4 }
  0x2c   : > { %p938_p8 = pnand %p936_p6, %p933_p5 }
  0x2e   : > { %941 = shalt.err (!%p938_p8)
}
  0x2f   : > { %s942_s30 = scalar_lea.vmem %s135_s3, 24576  ;;  %p950_p7 = scmp.lt.s32.totalorder %s135_s3, %s135_s3 }
  0x30   : > { %p943_p10 = scmp.ne.s32.totalorder %s135_s3, %s942_s30  ;;  %p951_p1 = scmp.lt.s32.totalorder %s942_s30, %s942_s30 }
  0x32   : > { %p945_p12 = pnand %p943_p10, %p931_p2  ;;  %p952_p3 = por %p951_p1, %p950_p7 }
  0x34   : > { %p946_p9 = pneg %p945_p12 }
  0x36   : > { %p953_p11 = pnand %p952_p3, %p946_p9 }
  0x38   : > { %956 = shalt.err (!%p953_p11)
}
  0x39   : > { %s1132_s5 = smov 128   ;;  %s1133_s6 = smov 8  }
  0x3a   : > { %804 = dma.hbm_to_vmem [thread:$0]  (!%p1255_p13), %s1657_s1, 24576, %s135_s3, [#allocation6], %s1132_s5, %s1132_s5, %s1133_s6  }
  0x3b   : > { %s31_s12 = sadd.s32 1, %s1117_s18  ;;  %s34_s22 = sadd.s32 1, %s1121_s19 }
  0x3c   : > { %p32_p1 = scmp.ge.s32.totalorder %s31_s12, 6  ;;  %s38_s23 = sadd.s32 1, %s1125_s20 }
  0x3d   : > { %s47_s30 = sadd.s32 1, %s1101_s14  ;;  %p54_p3 = scmp.ne.s32.totalorder %s1101_s14, %s1097_s13 }
  0x3e   : > { %s1689_s12 = smov (%p32_p1, %s31_s12), 0  ;;  %s1691_s22 = smov (!%p32_p1, %s34_s22), %s1121_s19 }
  0x3f   : > { %1658 = sst [smem:[#allocation19_spill]] %s1689_s12  ;;  %p55_p7 = scmp.eq.s32.totalorder %s1129_s21, 0 }
  0x40   : > { %p36_p9 = scmp.ge.s32.totalorder %s1691_s22, 2  ;;  %s92_s4 = ssub.s32 %s1117_s18, %s1689_s12 }
  0x41   : > { %p1287_p11 = por %p55_p7, %p54_p3  ;;  %p814_p13 = scmp.lt.s32.totalorder %s1129_s21, 24 }
  0x42   : > { %s1693_s22 = smov (%p36_p9, %s1691_s22), 0  ;;  %s1695_s23 = smov (!%p36_p9, %s38_s23), %s1125_s20 }
  0x43   : > { %1660 = sst [smem:[#allocation20_spill]] %s1693_s22  ;;  %s43_s5 = ssub.s32 %s1121_s19, %s1693_s22 }
  0x44   : > { %s148_s6 = sand.u32 1, %s1101_s14   ;;  %p40_p0 = scmp.ge.s32.totalorder %s1695_s23, 2 }
  0x45   : > { %s695_s7 = sshll.u32 %s148_s6, 9  ;;  %s711_s8 = sshll.u32 %s1121_s19, 6 }
  0x46   : > { %s1697_s23 = smov (%p40_p0, %s1695_s23), 0  ;;  %s698_s25 = sshll.u32 %s1125_s20, 7 }
  0x47   : > { %s42_s1 = ssub.s32 %s1125_s20, %s1697_s23  ;;  %s159_s12 = sadd.s32 %s711_s8, %s698_s25 }
  0x48   : > { %s44_s18 = sor.u32 %s43_s5, %s42_s1  ;;  %s93_s28 = sor.u32 %s92_s4, %s42_s1 }
  0x49   : > { %p45_p2 = scmp.eq.s32.totalorder %s44_s18, 0  ;;  %s95_s9 = sor.u32 %s93_s28, %s43_s5 }
  0x4a   : > { %p96_p4 = scmp.eq.s32.totalorder %s95_s9, 0  ;;  %s699_s22 = sshll.u32 %s159_s12, 7 }
  0x4b   : > { %s1305_s2 = scalar_select %p45_p2, %s1101_s14, %s47_s30  }
  0x4c   : > { %s1661_s27 = sadd.s32 1, %s1089_s11  ;;  %s1315_s10 = scalar_lea.hbm %s1622_s0, %s699_s22 }
  0x4d   : > { %s1310_s17 = scalar_select %p96_p4, %s1089_s11, %s1661_s27  }
  0x4e   : > { %s152_s25 = scalar_lea.vmem [#allocation2], %s695_s7  ;;  %p1323_p5 = pnand %p814_p13, %p1287_p11 }
  0x4f   : > { %s162_s1 = sshll.u32 %s152_s25, 4  ;;  %s1327_s18 = scalar_lea.sflag [#allocation3], %s148_s6  ;;  %s1317_s1 = int_to_ptr.vmem [resolvable:$true] %s162_s1 }
  0x50   : > { %s957_s16 = scalar_lea.hbm %s1315_s10, 8192  ;;  %p959_p8 = pneg %p1323_p5 }
  0x51   : > { %p958_p6 = scmp.ne.s32.totalorder %s1315_s10, %s957_s16  ;;  %s962_s28 = scalar_lea.hbm %s1622_s0, 32768 }
  0x52   : > { %p963_p1 = scmp.lt.u32.totalorder %s1315_s10, %s1622_s0  ;;  %p964_p3 = scmp.lt.u32.totalorder %s962_s28, %s957_s16 }
  0x53   : > { %p960_p10 = pnand %p959_p8, %p958_p6  ;;  %p966_p9 = scmp.lt.u32.totalorder %s957_s16, %s1315_s10 }
  0x54   : > { %p965_p7 = por %p964_p3, %p963_p1 }
  0x55   : > { %p961_p12 = pneg %p960_p10 }
  0x56   : > { %p967_p11 = por %p966_p9, %p965_p7 }
  0x58   : > { %p968_p13 = pnand %p967_p11, %p961_p12 }
  0x5a   : > { %971 = shalt.err (!%p968_p13)
}
  0x5b   : > { %s972_s30 = scalar_lea.vmem %s1317_s1, 8192  ;;  %s1134_s4 = smov [#allocation2]  }
  0x5c   : > { %p973_p0 = scmp.ne.s32.totalorder %s1317_s1, %s972_s30  ;;  %s977_s3 = sshll.u32 %s1134_s4, 4  ;;  %s978_s3 = int_to_ptr.vmem [resolvable:$false] %s977_s3 }
  0x5d   : > { %s979_s5 = scalar_lea.vmem %s978_s3, 16384  ;;  %p980_p6 = scmp.lt.s32.totalorder %s1317_s1, %s978_s3 }
  0x5e   : > { %p975_p2 = pnand %p973_p0, %p959_p8  ;;  %p981_p10 = scmp.lt.s32.totalorder %s979_s5, %s972_s30 }
  0x60   : > { %p976_p4 = pneg %p975_p2  ;;  %p982_p1 = por %p981_p10, %p980_p6 }
  0x62   : > { %p983_p3 = pnand %p982_p1, %p976_p4 }
  0x64   : > { %986 = shalt.err (!%p983_p3)
}
  0x65   : > { %s1135_s6 = smov 256   ;;  %s1136_s7 = smov 16  }
  0x66   : > { %808 = dma.hbm_to_vmem [thread:$0]  (!%p1323_p5), %s1315_s10, 8192, %s1317_s1, %s1327_s18, %s1135_s6, %s1135_s6, %s1136_s7  }
  0x67   : > { %p1663_p8 = scmp.ne.s32.totalorder %s1655_s29, 0 }
  0x68   : > { %s176_s8 = sand.u32 (!%p1663_p8), 1, %s1097_s13   ;;  %p1664_p12 = scmp.ne.s32.totalorder (!%p1663_p8), %s1650_s26, 0 }
  0x69   : > { %174 = sbr.rel (%p1663_p8) target bundleno = 471 (0x1d7), region = 28  ;;  %s701_s25 = sshll.u32 (!%p1663_p8), %s176_s8, 9 }
  0x6a   : > { %s177_s16 = scalar_lea.sflag (!%p1663_p8), [#allocation3], %s176_s8  ;;  %s1358_s19 = scalar_lea.vmem (!%p1663_p8), [#allocation2], %s701_s25 }
  0x70   : > { %1068 = dma.done.wait (%p1664_p12), %s177_s16, 8192  }
  0x71   : > { %1070 = vsyncadd (%p1664_p12), %s177_s16, 4294959104  ;;  %p1665_p7 = scmp.ne.s32.totalorder %s1649_s24, 0 }
  0x73   : > { %1072 = dma.done.wait (%p1665_p7), [#allocation6], 24576  }
  0x74   : > { %1074 = vsyncadd (%p1665_p7), [#allocation6], 4294942720  ;;  %v1137_v0 = vmov 0.0|0.0   ;;  %s704_s10 = sshll.u32 %s1105_s15, 8  ;;  %v242_v12 = vld [vmem:[%s1358_s19 + $0x8] sm:$0xff]  ;;  %v241_v51 = vld [vmem:[%s1358_s19] sm:$0xff] }
  0x75   : > { %712 = vmatprep.subr.bf16.mxu0 %v1137_v0  ;;  %760 = vmatprep.subr.bf16.mxu1 %v1137_v0  ;;  %s1371_s29 = scalar_lea.vmem [#allocation5], %s704_s10  ;;  %v274_v14 = vld [vmem:[%s1358_s19 + $0x108] sm:$0xff]  ;;  %v273_v52 = vld [vmem:[%s1358_s19 + $0x100] sm:$0xff]  ;;  %v244_v53 = vld [vmem:[%s1358_s19 + $0x18] sm:$0xff]  ;;  %s1666_s24 = sld [smem:[#allocation12_spill]] }
  0x76   : > { %v209_v1 = vld [vmem:[%s1371_s29] sm:$0xff]  ;;  %v210_v2 = vld [vmem:[%s1371_s29 + $0x8] sm:$0xff]  ;;  %v211_v3 = vld [vmem:[%s1371_s29 + $0x10] sm:$0xff]  ;;  %369 = vmatprep.mubr.f32.mxu0 %v242_v12  ;;  %449 = vmatprep.mubr.f32.mxu1 %v274_v14  ;;  %s1667_s18 = sld [smem:[#allocation13_spill]]  ;;  %s1668_s27 = sld [smem:[#allocation14_spill]] }
  0x77   : > { %v713_v4 = vpack.c.bf16 %v210_v2, %v209_v1  ;;  %v212_v5 = vld [vmem:[%s1371_s29 + $0x18] sm:$0xff]  ;;  %v213_v7 = vld [vmem:[%s1371_s29 + $0x20] sm:$0xff]  ;;  %v214_v8 = vld [vmem:[%s1371_s29 + $0x28] sm:$0xff]  ;;  %s707_s12 = sshll.u32 %s1105_s15, 6  ;;  %s1669_s5 = sld [smem:[#allocation17_spill]] }
  0x78   : > { %v716_v6 = vpack.c.bf16 %v212_v5, %v211_v3  ;;  %v719_v9 = vpack.c.bf16 %v214_v8, %v213_v7  ;;  %v215_v10 = vld [vmem:[%s1371_s29 + $0x30] sm:$0xff]  ;;  %v216_v11 = vld [vmem:[%s1371_s29 + $0x38] sm:$0xff]  ;;  %v217_v15 = vld [vmem:[%s1371_s29 + $0x40] sm:$0xff]  ;;  %s1670_s8 = sld [smem:[#allocation22_spill]]  ;;  %s1138_s10 = smov [#allocation7]  }
  0x79   : > { %714 = vmatpush1.bf16.msra.mxu0 %v713_v4  ;;  %776 = vmatpush1.bf16.msra.mxu1 %v713_v4  ;;  %v722_v13 = vpack.c.bf16 %v216_v11, %v215_v10  ;;  %v218_v16 = vld [vmem:[%s1371_s29 + $0x48] sm:$0xff]  ;;  %v219_v18 = vld [vmem:[%s1371_s29 + $0x50] sm:$0xff]  ;;  %v220_v19 = vld [vmem:[%s1371_s29 + $0x58] sm:$0xff] }
  0x7a   : > { %715 = vmatprep.subr.bf16.mxu0 %v1137_v0  ;;  %761 = vmatprep.subr.bf16.mxu1 %v1137_v0  ;;  %v725_v17 = vpack.c.bf16 %v218_v16, %v217_v15  ;;  %v728_v20 = vpack.c.bf16 %v220_v19, %v219_v18  ;;  %v221_v21 = vld [vmem:[%s1371_s29 + $0x60] sm:$0xff]  ;;  %v222_v22 = vld [vmem:[%s1371_s29 + $0x68] sm:$0xff]  ;;  %v223_v24 = vld [vmem:[%s1371_s29 + $0x70] sm:$0xff] }
  0x7b   : > { %v731_v23 = vpack.c.bf16 %v222_v22, %v221_v21  ;;  %v224_v25 = vld [vmem:[%s1371_s29 + $0x78] sm:$0xff]  ;;  %v225_v27 = vld [vmem:[%s1371_s29 + $0x80] sm:$0xff]  ;;  %v226_v28 = vld [vmem:[%s1371_s29 + $0x88] sm:$0xff]  ;;  %s202_s26 = sand.u32 1, %s1666_s24  }
  0x7c   : > { %v734_v26 = vpack.c.bf16 %v224_v25, %v223_v24  ;;  %v737_v29 = vpack.c.bf16 %v226_v28, %v225_v27  ;;  %v227_v30 = vld [vmem:[%s1371_s29 + $0x90] sm:$0xff]  ;;  %v228_v31 = vld [vmem:[%s1371_s29 + $0x98] sm:$0xff]  ;;  %v229_v33 = vld [vmem:[%s1371_s29 + $0xa0] sm:$0xff]  ;;  %s703_s1 = sshll.u32 %s202_s26, 8  ;;  %s706_s28 = sshll.u32 %s1667_s18, 5 }
  0x7d   : > { %717 = vmatpush1.bf16.msra.mxu0 %v716_v6  ;;  %777 = vmatpush1.bf16.msra.mxu1 %v716_v6  ;;  %v740_v32 = vpack.c.bf16 %v228_v31, %v227_v30  ;;  %v230_v34 = vld [vmem:[%s1371_s29 + $0xa8] sm:$0xff]  ;;  %v231_v36 = vld [vmem:[%s1371_s29 + $0xb0] sm:$0xff]  ;;  %v232_v37 = vld [vmem:[%s1371_s29 + $0xb8] sm:$0xff]  ;;  %s1502_s9 = scalar_lea.vmem [#allocation7], %s703_s1  ;;  %s792_s22 = smul.u32 384, %s1668_s27 }
  0x7e   : > { %718 = vmatprep.subr.bf16.mxu0 %v1137_v0  ;;  %762 = vmatprep.subr.bf16.mxu1 %v1137_v0  ;;  %v743_v35 = vpack.c.bf16 %v230_v34, %v229_v33  ;;  %v746_v38 = vpack.c.bf16 %v232_v37, %v231_v36  ;;  %v233_v39 = vld [vmem:[%s1371_s29 + $0xc0] sm:$0xff]  ;;  %v234_v40 = vld [vmem:[%s1371_s29 + $0xc8] sm:$0xff]  ;;  %v235_v42 = vld [vmem:[%s1371_s29 + $0xd0] sm:$0xff]  ;;  %s575_s30 = sadd.s32 %s707_s12, %s706_s28  ;;  %s580_s3 = sshll.u32 %s1502_s9, 4  ;;  %s1543_s3 = int_to_ptr.vmem [resolvable:$true] %s580_s3 }
  0x7f   : > { %v749_v41 = vpack.c.bf16 %v234_v40, %v233_v39  ;;  %v236_v43 = vld [vmem:[%s1371_s29 + $0xd8] sm:$0xff]  ;;  %v237_v45 = vld [vmem:[%s1371_s29 + $0xe0] sm:$0xff]  ;;  %v238_v46 = vld [vmem:[%s1371_s29 + $0xe8] sm:$0xff]  ;;  %s577_s4 = sadd.s32 %s792_s22, %s575_s30  ;;  %s1549_s16 = scalar_lea.sflag [#allocation4], %s202_s26 }
  0x80   : > { %v752_v44 = vpack.c.bf16 %v236_v43, %v235_v42  ;;  %v755_v47 = vpack.c.bf16 %v238_v46, %v237_v45  ;;  %v239_v48 = vld [vmem:[%s1371_s29 + $0xf0] sm:$0xff]  ;;  %v240_v49 = vld [vmem:[%s1371_s29 + $0xf8] sm:$0xff]  ;;  %v246_v57 = vld [vmem:[%s1358_s19 + $0x28] sm:$0xff]  ;;  %s708_s15 = sshll.u32 %s577_s4, 7  ;;  %p1671_p9 = scmp.ne.s32.totalorder %s1669_s5, 0 }
  0x81   : > { %720 = vmatpush1.bf16.msra.mxu0 %v719_v9  ;;  %778 = vmatpush1.bf16.msra.mxu1 %v719_v9  ;;  %v758_v50 = vpack.c.bf16 %v240_v49, %v239_v48  ;;  %v276_v54 = vld [vmem:[%s1358_s19 + $0x118] sm:$0xff]  ;;  %v243_v55 = vld [vmem:[%s1358_s19 + $0x10] sm:$0xff]  ;;  %v278_v58 = vld [vmem:[%s1358_s19 + $0x128] sm:$0xff]  ;;  %s1541_s25 = scalar_lea.hbm %s1670_s8, %s708_s15  ;;  %s991_s29 = sshll.u32 %s1138_s10, 4  ;;  %s992_s29 = int_to_ptr.vmem [resolvable:$false] %s991_s29 }
  0x82   : > { %721 = vmatprep.subr.bf16.mxu0 %v1137_v0  ;;  %763 = vmatprep.subr.bf16.mxu1 %v1137_v0  ;;  %v275_v56 = vld [vmem:[%s1358_s19 + $0x110] sm:$0xff]  ;;  %v245_v59 = vld [vmem:[%s1358_s19 + $0x20] sm:$0xff]  ;;  %v248_v61 = vld [vmem:[%s1358_s19 + $0x38] sm:$0xff]  ;;  %s993_s1 = scalar_lea.vmem %s992_s29, 8192  ;;  %p994_p0 = scmp.lt.s32.totalorder %s1543_s3, %s992_s29 }
  0x83   : > { %v277_v60 = vld [vmem:[%s1358_s19 + $0x120] sm:$0xff]  ;;  %v280_v62 = vld [vmem:[%s1358_s19 + $0x138] sm:$0xff]  ;;  %v247_v63 = vld [vmem:[%s1358_s19 + $0x30] sm:$0xff] }
  0x84   : > { %v250_v1 = vld [vmem:[%s1358_s19 + $0x48] sm:$0xff]  ;;  %v249_v3 = vld [vmem:[%s1358_s19 + $0x40] sm:$0xff]  ;;  %v252_v5 = vld [vmem:[%s1358_s19 + $0x58] sm:$0xff] }
  0x85   : > { %723 = vmatpush1.bf16.msra.mxu0 %v722_v13  ;;  %779 = vmatpush1.bf16.msra.mxu1 %v722_v13  ;;  %v282_v2 = vld [vmem:[%s1358_s19 + $0x148] sm:$0xff]  ;;  %v281_v4 = vld [vmem:[%s1358_s19 + $0x140] sm:$0xff]  ;;  %v284_v6 = vld [vmem:[%s1358_s19 + $0x158] sm:$0xff] }
  0x86   : > { %724 = vmatprep.subr.bf16.mxu0 %v1137_v0  ;;  %764 = vmatprep.subr.bf16.mxu1 %v1137_v0  ;;  %v251_v7 = vld [vmem:[%s1358_s19 + $0x50] sm:$0xff]  ;;  %v254_v9 = vld [vmem:[%s1358_s19 + $0x68] sm:$0xff]  ;;  %v253_v11 = vld [vmem:[%s1358_s19 + $0x60] sm:$0xff] }
  0x87   : > { %v283_v8 = vld [vmem:[%s1358_s19 + $0x150] sm:$0xff]  ;;  %v286_v10 = vld [vmem:[%s1358_s19 + $0x168] sm:$0xff]  ;;  %v285_v12 = vld [vmem:[%s1358_s19 + $0x160] sm:$0xff] }
  0x88   : > { %v256_v13 = vld [vmem:[%s1358_s19 + $0x78] sm:$0xff]  ;;  %v255_v15 = vld [vmem:[%s1358_s19 + $0x70] sm:$0xff]  ;;  %v290_v18 = vld [vmem:[%s1358_s19 + $0x188] sm:$0xff] }
  0x89   : > { %726 = vmatpush1.bf16.msra.mxu0 %v725_v17  ;;  %780 = vmatpush1.bf16.msra.mxu1 %v725_v17  ;;  %v288_v14 = vld [vmem:[%s1358_s19 + $0x178] sm:$0xff]  ;;  %v287_v16 = vld [vmem:[%s1358_s19 + $0x170] sm:$0xff]  ;;  %v258_v17 = vld [vmem:[%s1358_s19 + $0x88] sm:$0xff] }
  0x8a   : > { %727 = vmatprep.subr.bf16.mxu0 %v1137_v0  ;;  %765 = vmatprep.subr.bf16.mxu1 %v1137_v0  ;;  %v257_v19 = vld [vmem:[%s1358_s19 + $0x80] sm:$0xff]  ;;  %v260_v21 = vld [vmem:[%s1358_s19 + $0x98] sm:$0xff]  ;;  %v291_v24 = vld [vmem:[%s1358_s19 + $0x190] sm:$0xff] }
  0x8b   : > { %v292_v22 = vld [vmem:[%s1358_s19 + $0x198] sm:$0xff]  ;;  %v262_v25 = vld [vmem:[%s1358_s19 + $0xa8] sm:$0xff]  ;;  %v261_v27 = vld [vmem:[%s1358_s19 + $0xa0] sm:$0xff] }
  0x8c   : > { %v293_v28 = vld [vmem:[%s1358_s19 + $0x1a0] sm:$0xff]  ;;  %v296_v30 = vld [vmem:[%s1358_s19 + $0x1b8] sm:$0xff]  ;;  %v263_v31 = vld [vmem:[%s1358_s19 + $0xb0] sm:$0xff] }
  0x8d   : > { %729 = vmatpush1.bf16.msra.mxu0 %v728_v20  ;;  %781 = vmatpush1.bf16.msra.mxu1 %v728_v20  ;;  %v289_v20 = vld [vmem:[%s1358_s19 + $0x180] sm:$0xff]  ;;  %v266_v33 = vld [vmem:[%s1358_s19 + $0xc8] sm:$0xff]  ;;  %v268_v37 = vld [vmem:[%s1358_s19 + $0xd8] sm:$0xff] }
  0x8e   : > { %730 = vmatprep.subr.bf16.mxu0 %v1137_v0  ;;  %766 = vmatprep.subr.bf16.mxu1 %v1137_v0  ;;  %v298_v34 = vld [vmem:[%s1358_s19 + $0x1c8] sm:$0xff]  ;;  %v297_v36 = vld [vmem:[%s1358_s19 + $0x1c0] sm:$0xff]  ;;  %v267_v39 = vld [vmem:[%s1358_s19 + $0xd0] sm:$0xff] }
  0x8f   : > { %v299_v40 = vld [vmem:[%s1358_s19 + $0x1d0] sm:$0xff]  ;;  %v302_v42 = vld [vmem:[%s1358_s19 + $0x1e8] sm:$0xff]  ;;  %v269_v43 = vld [vmem:[%s1358_s19 + $0xe0] sm:$0xff] }
  0x90   : > { %v272_v45 = vld [vmem:[%s1358_s19 + $0xf8] sm:$0xff]  ;;  %v303_v48 = vld [vmem:[%s1358_s19 + $0x1f0] sm:$0xff] }
  0x91   : > { %732 = vmatpush1.bf16.msra.mxu0 %v731_v23  ;;  %782 = vmatpush1.bf16.msra.mxu1 %v731_v23  ;;  %v259_v23 = vld [vmem:[%s1358_s19 + $0x90] sm:$0xff]  ;;  %v304_v46 = vld [vmem:[%s1358_s19 + $0x1f8] sm:$0xff] }
  0x92   : > { %733 = vmatprep.subr.bf16.mxu0 %v1137_v0  ;;  %767 = vmatprep.subr.bf16.mxu1 %v1137_v0 }
  0x95   : > { %735 = vmatpush1.bf16.msra.mxu0 %v734_v26  ;;  %783 = vmatpush1.bf16.msra.mxu1 %v734_v26  ;;  %v294_v26 = vld [vmem:[%s1358_s19 + $0x1a8] sm:$0xff] }
  0x96   : > { %736 = vmatprep.subr.bf16.mxu0 %v1137_v0  ;;  %768 = vmatprep.subr.bf16.mxu1 %v1137_v0 }
  0x99   : > { %738 = vmatpush1.bf16.msra.mxu0 %v737_v29  ;;  %784 = vmatpush1.bf16.msra.mxu1 %v737_v29  ;;  %v264_v29 = vld [vmem:[%s1358_s19 + $0xb8] sm:$0xff] }
  0x9a   : > { %739 = vmatprep.subr.bf16.mxu0 %v1137_v0  ;;  %769 = vmatprep.subr.bf16.mxu1 %v1137_v0 }
  0x9d   : > { %741 = vmatpush1.bf16.msra.mxu0 %v740_v32  ;;  %785 = vmatpush1.bf16.msra.mxu1 %v740_v32  ;;  %v295_v32 = vld [vmem:[%s1358_s19 + $0x1b0] sm:$0xff] }
  0x9e   : > { %742 = vmatprep.subr.bf16.mxu0 %v1137_v0  ;;  %770 = vmatprep.subr.bf16.mxu1 %v1137_v0 }
  0xa1   : > { %744 = vmatpush1.bf16.msra.mxu0 %v743_v35  ;;  %786 = vmatpush1.bf16.msra.mxu1 %v743_v35  ;;  %v265_v35 = vld [vmem:[%s1358_s19 + $0xc0] sm:$0xff] }
  0xa2   : > { %745 = vmatprep.subr.bf16.mxu0 %v1137_v0  ;;  %771 = vmatprep.subr.bf16.mxu1 %v1137_v0 }
  0xa5   : > { %747 = vmatpush1.bf16.msra.mxu0 %v746_v38  ;;  %787 = vmatpush1.bf16.msra.mxu1 %v746_v38  ;;  %v300_v38 = vld [vmem:[%s1358_s19 + $0x1d8] sm:$0xff] }
  0xa6   : > { %748 = vmatprep.subr.bf16.mxu0 %v1137_v0  ;;  %772 = vmatprep.subr.bf16.mxu1 %v1137_v0 }
  0xa9   : > { %750 = vmatpush1.bf16.msra.mxu0 %v749_v41  ;;  %788 = vmatpush1.bf16.msra.mxu1 %v749_v41  ;;  %v270_v41 = vld [vmem:[%s1358_s19 + $0xe8] sm:$0xff] }
  0xaa   : > { %751 = vmatprep.subr.bf16.mxu0 %v1137_v0  ;;  %773 = vmatprep.subr.bf16.mxu1 %v1137_v0 }
  0xad   : > { %753 = vmatpush1.bf16.msra.mxu0 %v752_v44  ;;  %789 = vmatpush1.bf16.msra.mxu1 %v752_v44  ;;  %v301_v44 = vld [vmem:[%s1358_s19 + $0x1e0] sm:$0xff] }
  0xae   : > { %754 = vmatprep.subr.bf16.mxu0 %v1137_v0  ;;  %774 = vmatprep.subr.bf16.mxu1 %v1137_v0 }
  0xb1   : > { %756 = vmatpush1.bf16.msra.mxu0 %v755_v47  ;;  %790 = vmatpush1.bf16.msra.mxu1 %v755_v47  ;;  %v271_v47 = vld [vmem:[%s1358_s19 + $0xf0] sm:$0xff] }
  0xb2   : > { %757 = vmatprep.subr.bf16.mxu0 %v1137_v0  ;;  %775 = vmatprep.subr.bf16.mxu1 %v1137_v0  ;;  %v279_v0 = vld [vmem:[%s1358_s19 + $0x130] sm:$0xff]  ;;  %s987_s19 = scalar_lea.vmem %s1543_s3, 4096 }
  0xb3   : > { %p988_p5 = scmp.ne.s32.totalorder %s1543_s3, %s987_s19  ;;  %p995_p2 = scmp.lt.s32.totalorder %s993_s1, %s987_s19 }
  0xb5   : > { %759 = vmatpush1.bf16.msra.mxu0 %v758_v50  ;;  %791 = vmatpush1.bf16.msra.mxu1 %v758_v50  ;;  %p989_p11 = pnand %p988_p5, %p1671_p9  ;;  %p996_p4 = por %p995_p2, %p994_p0 }
  0xb7   : > { %p990_p13 = pneg %p989_p11 }
  0xb8   : > { %370 = vmatmul.mubr.f32.vlgmr.msra.gmra.mrb[0].mxu0 %v241_v51  ;;  %450 = vmatmul.mubr.f32.vlgmr.msra.gmra.mrb[0].mxu1 %v273_v52 }
  0xb9   : > { %374 = vmatprep.mubr.f32.mxu0 %v244_v53  ;;  %454 = vmatprep.mubr.f32.mxu1 %v276_v54  ;;  %p997_p6 = pnand %p996_p4, %p990_p13 }
  0xbc   : > { %375 = vmatmul.mubr.f32.gmra.mrb[2].mxu0 %v243_v55  ;;  %455 = vmatmul.mubr.f32.gmra.mrb[2].mxu1 %v275_v56 }
  0xbd   : > { %379 = vmatprep.mubr.f32.mxu0 %v246_v57  ;;  %459 = vmatprep.mubr.f32.mxu1 %v278_v58 }
  0xc0   : > { %380 = vmatmul.mubr.f32.gmra.mrb[4].mxu0 %v245_v59  ;;  %460 = vmatmul.mubr.f32.gmra.mrb[4].mxu1 %v277_v60 }
  0xc1   : > { %384 = vmatprep.mubr.f32.mxu0 %v248_v61  ;;  %464 = vmatprep.mubr.f32.mxu1 %v280_v62 }
  0xc4   : > { %385 = vmatmul.mubr.f32.gmra.mrb[6].mxu0 %v247_v63  ;;  %465 = vmatmul.mubr.f32.gmra.mrb[6].mxu1 %v279_v0 }
  0xc5   : > { %389 = vmatprep.mubr.f32.mxu0 %v250_v1  ;;  %469 = vmatprep.mubr.f32.mxu1 %v282_v2 }
  0xc8   : > { %390 = vmatmul.mubr.f32.gmra.mrb[8].mxu0 %v249_v3  ;;  %470 = vmatmul.mubr.f32.gmra.mrb[8].mxu1 %v281_v4 }
  0xc9   : > { %394 = vmatprep.mubr.f32.mxu0 %v252_v5  ;;  %474 = vmatprep.mubr.f32.mxu1 %v284_v6 }
  0xcc   : > { %395 = vmatmul.mubr.f32.gmra.mrb[10].mxu0 %v251_v7  ;;  %475 = vmatmul.mubr.f32.gmra.mrb[10].mxu1 %v283_v8 }
  0xcd   : > { %399 = vmatprep.mubr.f32.mxu0 %v254_v9  ;;  %479 = vmatprep.mubr.f32.mxu1 %v286_v10 }
  0xd0   : > { %400 = vmatmul.mubr.f32.gmra.mrb[12].mxu0 %v253_v11  ;;  %480 = vmatmul.mubr.f32.gmra.mrb[12].mxu1 %v285_v12 }
  0xd1   : > { %404 = vmatprep.mubr.f32.mxu0 %v256_v13  ;;  %484 = vmatprep.mubr.f32.mxu1 %v288_v14 }
  0xd4   : > { %405 = vmatmul.mubr.f32.gmra.mrb[14].mxu0 %v255_v15  ;;  %485 = vmatmul.mubr.f32.gmra.mrb[14].mxu1 %v287_v16 }
  0xd5   : > { %409 = vmatprep.mubr.f32.mxu0 %v258_v17  ;;  %489 = vmatprep.mubr.f32.mxu1 %v290_v18 }
  0xd8   : > { %410 = vmatmul.mubr.f32.gmra.mrb[16].mxu0 %v257_v19  ;;  %490 = vmatmul.mubr.f32.gmra.mrb[16].mxu1 %v289_v20 }
  0xd9   : > { %414 = vmatprep.mubr.f32.mxu0 %v260_v21  ;;  %494 = vmatprep.mubr.f32.mxu1 %v292_v22 }
  0xdc   : > { %415 = vmatmul.mubr.f32.gmra.mrb[18].mxu0 %v259_v23  ;;  %495 = vmatmul.mubr.f32.gmra.mrb[18].mxu1 %v291_v24 }
  0xdd   : > { %419 = vmatprep.mubr.f32.mxu0 %v262_v25  ;;  %499 = vmatprep.mubr.f32.mxu1 %v294_v26 }
  0xe0   : > { %420 = vmatmul.mubr.f32.gmra.mrb[20].mxu0 %v261_v27  ;;  %500 = vmatmul.mubr.f32.gmra.mrb[20].mxu1 %v293_v28 }
  0xe1   : > { %424 = vmatprep.mubr.f32.mxu0 %v264_v29  ;;  %504 = vmatprep.mubr.f32.mxu1 %v296_v30 }
  0xe4   : > { %425 = vmatmul.mubr.f32.gmra.mrb[22].mxu0 %v263_v31  ;;  %505 = vmatmul.mubr.f32.gmra.mrb[22].mxu1 %v295_v32 }
  0xe5   : > { %429 = vmatprep.mubr.f32.mxu0 %v266_v33  ;;  %509 = vmatprep.mubr.f32.mxu1 %v298_v34 }
  0xe8   : > { %430 = vmatmul.mubr.f32.gmra.mrb[24].mxu0 %v265_v35  ;;  %510 = vmatmul.mubr.f32.gmra.mrb[24].mxu1 %v297_v36 }
  0xe9   : > { %434 = vmatprep.mubr.f32.mxu0 %v268_v37  ;;  %514 = vmatprep.mubr.f32.mxu1 %v300_v38 }
  0xec   : > { %435 = vmatmul.mubr.f32.gmra.mrb[26].mxu0 %v267_v39  ;;  %515 = vmatmul.mubr.f32.gmra.mrb[26].mxu1 %v299_v40 }
  0xed   : > { %439 = vmatprep.mubr.f32.mxu0 %v270_v41  ;;  %519 = vmatprep.mubr.f32.mxu1 %v302_v42 }
  0xf0   : > { %440 = vmatmul.mubr.f32.gmra.mrb[28].mxu0 %v269_v43  ;;  %520 = vmatmul.mubr.f32.gmra.mrb[28].mxu1 %v301_v44 }
  0xf1   : > { %444 = vmatprep.mubr.f32.mxu0 %v272_v45  ;;  %524 = vmatprep.mubr.f32.mxu1 %v304_v46 }
  0xf4   : > { %445 = vmatmul.mubr.f32.gmra.mrb[30].mxu0 %v271_v47  ;;  %525 = vmatmul.mubr.f32.gmra.mrb[30].mxu1 %v303_v48 }
 0x18b   : > { %v371_v49 = vpop.f32.mrb[0].mxu0  ;;  %v451_v50 = vpop.f32.mrb[0].mxu1 }
 0x18c   : > { %530 = vst [vmem:[%s1502_s9] sm:$0xff] %v371_v49  ;;  %546 = vst [vmem:[%s1502_s9 + $0x80] sm:$0xff] %v451_v50  ;;  %v373_v51 = vpop.f32.mrb[1].mxu0  ;;  %v453_v52 = vpop.f32.mrb[1].mxu1 }
 0x18f   : > { %v376_v53 = vpop.f32.mrb[2].mxu0  ;;  %v456_v54 = vpop.f32.mrb[2].mxu1 }
 0x190   : > { %531 = vst [vmem:[%s1502_s9 + $0x8] sm:$0xff] %v376_v53  ;;  %547 = vst [vmem:[%s1502_s9 + $0x88] sm:$0xff] %v456_v54  ;;  %v378_v55 = vpop.f32.mrb[3].mxu0  ;;  %v458_v56 = vpop.f32.mrb[3].mxu1 }
 0x193   : > { %v381_v57 = vpop.f32.mrb[4].mxu0  ;;  %v461_v58 = vpop.f32.mrb[4].mxu1 }
 0x194   : > { %532 = vst [vmem:[%s1502_s9 + $0x10] sm:$0xff] %v381_v57  ;;  %548 = vst [vmem:[%s1502_s9 + $0x90] sm:$0xff] %v461_v58  ;;  %v383_v59 = vpop.f32.mrb[5].mxu0  ;;  %v463_v60 = vpop.f32.mrb[5].mxu1 }
 0x197   : > { %v386_v61 = vpop.f32.mrb[6].mxu0  ;;  %v466_v62 = vpop.f32.mrb[6].mxu1 }
 0x198   : > { %533 = vst [vmem:[%s1502_s9 + $0x18] sm:$0xff] %v386_v61  ;;  %549 = vst [vmem:[%s1502_s9 + $0x98] sm:$0xff] %v466_v62  ;;  %v388_v63 = vpop.f32.mrb[7].mxu0  ;;  %v468_v0 = vpop.f32.mrb[7].mxu1 }
 0x19b   : > { %v391_v1 = vpop.f32.mrb[8].mxu0  ;;  %v471_v2 = vpop.f32.mrb[8].mxu1 }
 0x19c   : > { %534 = vst [vmem:[%s1502_s9 + $0x20] sm:$0xff] %v391_v1  ;;  %550 = vst [vmem:[%s1502_s9 + $0xa0] sm:$0xff] %v471_v2  ;;  %v393_v3 = vpop.f32.mrb[9].mxu0  ;;  %v473_v4 = vpop.f32.mrb[9].mxu1 }
 0x19f   : > { %v396_v5 = vpop.f32.mrb[10].mxu0  ;;  %v476_v6 = vpop.f32.mrb[10].mxu1 }
 0x1a0   : > { %535 = vst [vmem:[%s1502_s9 + $0x28] sm:$0xff] %v396_v5  ;;  %551 = vst [vmem:[%s1502_s9 + $0xa8] sm:$0xff] %v476_v6  ;;  %v398_v7 = vpop.f32.mrb[11].mxu0  ;;  %v478_v8 = vpop.f32.mrb[11].mxu1 }
 0x1a3   : > { %v401_v9 = vpop.f32.mrb[12].mxu0  ;;  %v481_v10 = vpop.f32.mrb[12].mxu1 }
 0x1a4   : > { %536 = vst [vmem:[%s1502_s9 + $0x30] sm:$0xff] %v401_v9  ;;  %552 = vst [vmem:[%s1502_s9 + $0xb0] sm:$0xff] %v481_v10  ;;  %v403_v11 = vpop.f32.mrb[13].mxu0  ;;  %v483_v12 = vpop.f32.mrb[13].mxu1 }
 0x1a7   : > { %v406_v13 = vpop.f32.mrb[14].mxu0  ;;  %v486_v14 = vpop.f32.mrb[14].mxu1 }
 0x1a8   : > { %537 = vst [vmem:[%s1502_s9 + $0x38] sm:$0xff] %v406_v13  ;;  %553 = vst [vmem:[%s1502_s9 + $0xb8] sm:$0xff] %v486_v14  ;;  %v408_v15 = vpop.f32.mrb[15].mxu0  ;;  %v488_v16 = vpop.f32.mrb[15].mxu1 }
 0x1ab   : > { %v411_v17 = vpop.f32.mrb[16].mxu0  ;;  %v491_v18 = vpop.f32.mrb[16].mxu1 }
 0x1ac   : > { %538 = vst [vmem:[%s1502_s9 + $0x40] sm:$0xff] %v411_v17  ;;  %554 = vst [vmem:[%s1502_s9 + $0xc0] sm:$0xff] %v491_v18  ;;  %v413_v19 = vpop.f32.mrb[17].mxu0  ;;  %v493_v20 = vpop.f32.mrb[17].mxu1 }
 0x1af   : > { %v416_v21 = vpop.f32.mrb[18].mxu0  ;;  %v496_v22 = vpop.f32.mrb[18].mxu1 }
 0x1b0   : > { %539 = vst [vmem:[%s1502_s9 + $0x48] sm:$0xff] %v416_v21  ;;  %555 = vst [vmem:[%s1502_s9 + $0xc8] sm:$0xff] %v496_v22  ;;  %v418_v23 = vpop.f32.mrb[19].mxu0  ;;  %v498_v24 = vpop.f32.mrb[19].mxu1 }
 0x1b3   : > { %v421_v25 = vpop.f32.mrb[20].mxu0  ;;  %v501_v26 = vpop.f32.mrb[20].mxu1 }
 0x1b4   : > { %540 = vst [vmem:[%s1502_s9 + $0x50] sm:$0xff] %v421_v25  ;;  %556 = vst [vmem:[%s1502_s9 + $0xd0] sm:$0xff] %v501_v26  ;;  %v423_v27 = vpop.f32.mrb[21].mxu0  ;;  %v503_v28 = vpop.f32.mrb[21].mxu1 }
 0x1b7   : > { %v426_v29 = vpop.f32.mrb[22].mxu0  ;;  %v506_v30 = vpop.f32.mrb[22].mxu1 }
 0x1b8   : > { %541 = vst [vmem:[%s1502_s9 + $0x58] sm:$0xff] %v426_v29  ;;  %557 = vst [vmem:[%s1502_s9 + $0xd8] sm:$0xff] %v506_v30  ;;  %v428_v31 = vpop.f32.mrb[23].mxu0  ;;  %v508_v32 = vpop.f32.mrb[23].mxu1 }
 0x1bb   : > { %v431_v33 = vpop.f32.mrb[24].mxu0  ;;  %v511_v34 = vpop.f32.mrb[24].mxu1 }
 0x1bc   : > { %542 = vst [vmem:[%s1502_s9 + $0x60] sm:$0xff] %v431_v33  ;;  %558 = vst [vmem:[%s1502_s9 + $0xe0] sm:$0xff] %v511_v34  ;;  %v433_v35 = vpop.f32.mrb[25].mxu0  ;;  %v513_v36 = vpop.f32.mrb[25].mxu1 }
 0x1bf   : > { %v436_v37 = vpop.f32.mrb[26].mxu0  ;;  %v516_v38 = vpop.f32.mrb[26].mxu1 }
 0x1c0   : > { %543 = vst [vmem:[%s1502_s9 + $0x68] sm:$0xff] %v436_v37  ;;  %559 = vst [vmem:[%s1502_s9 + $0xe8] sm:$0xff] %v516_v38  ;;  %v438_v39 = vpop.f32.mrb[27].mxu0  ;;  %v518_v40 = vpop.f32.mrb[27].mxu1 }
 0x1c3   : > { %v441_v41 = vpop.f32.mrb[28].mxu0  ;;  %v521_v42 = vpop.f32.mrb[28].mxu1 }
 0x1c4   : > { %544 = vst [vmem:[%s1502_s9 + $0x70] sm:$0xff] %v441_v41  ;;  %560 = vst [vmem:[%s1502_s9 + $0xf0] sm:$0xff] %v521_v42  ;;  %v443_v43 = vpop.f32.mrb[29].mxu0  ;;  %v523_v44 = vpop.f32.mrb[29].mxu1 }
 0x1c7   : > { %v446_v45 = vpop.f32.mrb[30].mxu0  ;;  %v526_v46 = vpop.f32.mrb[30].mxu1 }
 0x1c8   : > { %545 = vst [vmem:[%s1502_s9 + $0x78] sm:$0xff] %v446_v45  ;;  %561 = vst [vmem:[%s1502_s9 + $0xf8] sm:$0xff] %v526_v46  ;;  %v448_v47 = vpop.f32.mrb[31].mxu0  ;;  %v528_v48 = vpop.f32.mrb[31].mxu1 }
 0x1c9   : > { %1000 = shalt.err (!%p997_p6)
}
 0x1ca   : > { %s1001_s24 = scalar_lea.hbm %s1541_s25, 4096  ;;  %s1005_s18 = scalar_lea.hbm %s1670_s8, 98304 }
 0x1cb   : > { %p1002_p10 = scmp.ne.s32.totalorder %s1541_s25, %s1001_s24  ;;  %p1006_p8 = scmp.lt.u32.totalorder %s1541_s25, %s1670_s8 }
 0x1cc   : > { %p1007_p12 = scmp.lt.u32.totalorder %s1005_s18, %s1001_s24  ;;  %p1009_p5 = scmp.lt.u32.totalorder %s1001_s24, %s1541_s25 }
 0x1cd   : > { %p1003_p1 = pnand %p1002_p10, %p1671_p9 }
 0x1ce   : > { %p1008_p7 = por %p1007_p12, %p1006_p8 }
 0x1cf   : > { %p1004_p3 = pneg %p1003_p1 }
 0x1d0   : > { %p1010_p11 = por %p1009_p5, %p1008_p7 }
 0x1d2   : > { %p1011_p13 = pnand %p1010_p11, %p1004_p3 }
 0x1d4   : > { %1014 = shalt.err (!%p1011_p13)
}
 0x1d5   : > { %s1139_s12 = smov 128   ;;  %s1140_s22 = smov 8  }
 0x1d6   : > { %799 = dma.vmem_to_hbm [thread:$0]  (%p1671_p9), %s1543_s3, 4096, %s1541_s25, %s1549_s16, %s1139_s12, %s1139_s12, %s1140_s22  }
 0x1d7 PF: > { %s1672_s30 = sld [smem:[#allocation11_spill]]  ;;  %s1673_s4 = sld [smem:[#allocation18_spill]] }
 0x1d8   : > { %p816_p0 = scmp.ge.s32.totalorder %s1129_s21, 2 }
 0x1dd   : > { %s595_s15 = sand.u32 1, %s1672_s30   ;;  %p1674_p2 = scmp.ne.s32.totalorder %s1673_s4, 0 }
 0x1de   : > { %s596_s6 = scalar_lea.sflag [#allocation4], %s595_s15 }
 0x1df   : > { %p810_p4 = pnand %p816_p0, %p1674_p2 }
 0x1e1   : > { %1076 = dma.done.wait (!%p810_p4), %s596_s6, 4096  }
 0x1e2   : > { %1078 = vsyncadd (!%p810_p4), %s596_s6, 4294963200  ;;  %s19_s21 = sadd.s32 1, %s1129_s21   ;;  %s1676_s9 = sld [smem:[#allocation12_spill]] }
 0x1e3   : > { %p1578_p6 = scmp.ge.s32.totalorder %s19_s21, 26   ;;  %s1677_s15 = sld [smem:[#allocation15_spill]] }
 0x1e4   : > { %s1678_s16 = sld [smem:[#allocation16_spill]]  ;;  %s1679_s18 = sld [smem:[#allocation19_spill]] }
 0x1e5   : > { %s1680_s19 = sld [smem:[#allocation20_spill]]  ;;  %s1681_s10 = smov %s1089_s11 }
 0x1e6   : > { %s1682_s11 = smov %s1310_s17  ;;  %s1683_s12 = smov %s1097_s13 }
 0x1e7   : > { %s1684_s13 = smov %s1101_s14  ;;  %s1685_s14 = smov %s1305_s2 }
 0x1e8   : > { %s1686_s17 = smov %s1125_s20  ;;  %s1687_s20 = smov %s1697_s23 }
 0x1e9   :  { %18 = sbr.rel (!%p1578_p6) target bundleno = 14 (0xe), region = 78 }
 0x1f0   :  { %601 = vsyncpa [#allocation3], 1 }
 0x1f1   :  { %603 = vsyncpa [#allocation3 + $0x1], 1 }
 0x1f2   :  { %604 = vsyncpa [#allocation6], 1 }
 0x1f3   :  { %605 = vsyncpa [#allocation4], 1 }
 0x1f4   :  { %607 = vsyncpa [#allocation4 + $0x1], 1 }

</bundles_post_ra>
